<compile_context>
chip_gen: v5e
topology: v5e:2x2
jax: 0.10.0
libtpu: 0.0.40
codegen_flags: <defaults>
</compile_context>

<pallas_src>
import jax
import jax.numpy as jnp
from jax.experimental import pallas as pl
from jax.experimental.pallas import tpu as pltpu


def _qfunc_kernel(s_ref, a_ref, w1s_ref, w1a_ref, b1_ref, w2_ref, b2_ref,
                  w3_ref, b3_ref, o_ref):
    """One batch tile: (tb, obs) x (tb, act) -> (1, tb) Q row."""
    wdt = w1s_ref.dtype  # matmul operand dtype (f32 or bf16); accum is f32.

    # fc1 split across the former concat boundary (two MXU passes, f32 accum).
    h1 = (jnp.dot(s_ref[...].astype(wdt), w1s_ref[...],
                  preferred_element_type=jnp.float32)
          + jnp.dot(a_ref[...].astype(wdt), w1a_ref[...],
                    preferred_element_type=jnp.float32)
          + b1_ref[...])
    h1 = jnp.maximum(h1, 0.0)                        # f32 on the VPU

    # fc2 on the MXU, f32 accumulation, f32 bias + ReLU.
    h2 = jnp.dot(h1.astype(w2_ref.dtype), w2_ref[...],
                 preferred_element_type=jnp.float32) + b2_ref[...]
    h2 = jnp.maximum(h2, 0.0)

    # fc3 (N=1): VPU multiply + lane reduce instead of a 1-column MXU matmul.
    q = jnp.sum(h2 * w3_ref[...], axis=-1)           # (tb,) f32
    o_ref[...] = q[None, :] + b3_ref[...]            # lane-dense (1, tb) store


def mlp_qfunction(state, action, params, *, block_batch=512,
                  vmem_limit_bytes=32 * 1024 * 1024):
    """state: (B, obs_dim), action: (B, act_dim) -> (B,) Q-values."""
    w1s, w1a, b1, w2, b2, w3, b3 = params
    obs_dim = state.shape[-1]
    act_dim = action.shape[-1]
    hidden = w2.shape[0]
    B = state.shape[0]

    state = state.astype(jnp.float32)
    action = action.astype(jnp.float32)

    # Batch tile: multiple of 128 (lane-dense output), capped at block_batch.
    tb = min(block_batch, 128 * pl.cdiv(B, 128))
    b_pad = tb * pl.cdiv(B, tb)
    if b_pad != B:
        state = jnp.pad(state, ((0, b_pad - B), (0, 0)))
        action = jnp.pad(action, ((0, b_pad - B), (0, 0)))

    q = pl.pallas_call(
        _qfunc_kernel,
        out_shape=jax.ShapeDtypeStruct((1, b_pad), jnp.float32),
        grid_spec=pltpu.PrefetchScalarGridSpec(
            num_scalar_prefetch=0,
            grid=(b_pad // tb,),
            in_specs=[
                pl.BlockSpec((tb, obs_dim), lambda i: (i, 0)),   # state tile
                pl.BlockSpec((tb, act_dim), lambda i: (i, 0)),   # action tile
                pl.BlockSpec((obs_dim, hidden), lambda i: (0, 0)),  # w1_s
                pl.BlockSpec((act_dim, hidden), lambda i: (0, 0)),  # w1_a
                pl.BlockSpec((1, hidden), lambda i: (0, 0)),        # b1
                pl.BlockSpec((hidden, hidden), lambda i: (0, 0)),   # w2
                pl.BlockSpec((1, hidden), lambda i: (0, 0)),        # b2
                pl.BlockSpec((1, hidden), lambda i: (0, 0)),        # w3 row
                pl.BlockSpec((1, 1), lambda i: (0, 0)),             # b3
            ],
            out_specs=pl.BlockSpec((1, tb), lambda i: (0, i)),
        ),
        compiler_params=pltpu.CompilerParams(
            dimension_semantics=("parallel",),
            vmem_limit_bytes=vmem_limit_bytes,
        ),
    )(state, action, w1s, w1a, b1, w2, b2, w3, b3)

    # squeeze(-1) + drop padded rows: free wrapper-side layout plumbing.
    return q[0, :B]


def init_params(key, obs_dim, act_dim, hidden_dim=128, init_w=0.003,
                matmul_dtype=jnp.float32):
    """Synthetic init mirroring the torch module.

    Weights are stored transposed vs. torch.nn.Linear (in_features,
    out_features), with fc1 pre-split along its input dim into (w1_s, w1_a).
    w1/w2 may be bf16 (matmul operands); biases, w3 and b3 stay f32 since the
    bias add / ReLU / fc3 reduce run on the VPU in f32.
    """
    in_dim = obs_dim + act_dim
    k1, k2, k3, k4, k5, k6 = jax.random.split(key, 6)

    def uni(k, shape, bound):
        return jax.random.uniform(k, shape, jnp.float32, -bound, bound)

    b1_bound = 1.0 / (in_dim ** 0.5)
    b2_bound = 1.0 / (hidden_dim ** 0.5)
    w1 = uni(k1, (in_dim, hidden_dim), b1_bound)
    w1s = w1[:obs_dim].astype(matmul_dtype)
    w1a = w1[obs_dim:].astype(matmul_dtype)
    b1 = uni(k2, (1, hidden_dim), b1_bound)
    w2 = uni(k3, (hidden_dim, hidden_dim), b2_bound).astype(matmul_dtype)
    b2 = uni(k4, (1, hidden_dim), b2_bound)
    w3 = uni(k5, (1, hidden_dim), init_w)        # fc3 weight as a lane row
    b3 = uni(k6, (1, 1), init_w)
    return (w1s, w1a, b1, w2, b2, w3, b3)


def _reference(state, action, params):
    """Plain-JAX reference of the same math (f32)."""
    w1s, w1a, b1, w2, b2, w3, b3 = params
    h1 = jnp.maximum(state @ w1s.astype(jnp.float32)
                     + action @ w1a.astype(jnp.float32) + b1, 0.0)
    h2 = jnp.maximum(h1 @ w2.astype(jnp.float32) + b2, 0.0)
    return jnp.sum(h2 * w3, axis=-1) + b3[0, 0]


if __name__ == "__main__":
    obs_dim, act_dim, hidden_dim, batch = 12, 4, 128, 8
    key = jax.random.PRNGKey(0)
    kp, ks, ka = jax.random.split(key, 3)

    state = jax.random.normal(ks, (batch, obs_dim), jnp.float32)
    action = jax.random.normal(ka, (batch, act_dim), jnp.float32)

    # f32 weights: tight check against the plain-JAX reference.
    params_f32 = init_params(kp, obs_dim, act_dim, hidden_dim)
    q = mlp_qfunction(state, action, params_f32)
    jax.block_until_ready(q)

    q_ref = _reference(state, action, params_f32)
    assert q.shape == (batch,)
    assert jnp.allclose(q, q_ref, atol=1e-4, rtol=1e-4)

    # bf16 matmul weights (v6e/v7x MXU-native path); f32 accum, f32 VPU math.
    params_bf16 = init_params(kp, obs_dim, act_dim, hidden_dim,
                              matmul_dtype=jnp.bfloat16)
    q_bf16 = mlp_qfunction(state, action, params_bf16)
    jax.block_until_ready(q_bf16)
    assert q_bf16.shape == (batch,)
    assert jnp.allclose(q_bf16, q_ref, atol=2e-2, rtol=0.0)

    print("KERNEL_OK")
</pallas_src>

<mosaic_0001>
module attributes {stable_mosaic.version = 11 : i64} {
  func.func @_qfunc_kernel(%arg0: i32, %arg1: memref<128x12xf32, #tpu.memory_space<vmem>>, %arg2: memref<128x4xf32, #tpu.memory_space<vmem>>, %arg3: memref<12x128xf32, #tpu.memory_space<vmem>>, %arg4: memref<4x128xf32, #tpu.memory_space<vmem>>, %arg5: memref<1x128xf32, #tpu.memory_space<vmem>>, %arg6: memref<128x128xf32, #tpu.memory_space<vmem>>, %arg7: memref<1x128xf32, #tpu.memory_space<vmem>>, %arg8: memref<1x128xf32, #tpu.memory_space<vmem>>, %arg9: memref<1x1xf32, #tpu.memory_space<vmem>>, %arg10: memref<1x128xf32, #tpu.memory_space<vmem>>) attributes {dimension_semantics = [#tpu.dimension_semantics<parallel>], iteration_bounds = array<i64: 1>, scalar_prefetch = 0 : i64, scratch_operands = 0 : i64, tpu.core_type = #tpu.core_type<tc>, window_params = [{transform_indices = @transform_0, window_bounds = array<i64: 128, 12>}, {transform_indices = @transform_1, window_bounds = array<i64: 128, 4>}, {pipeline_mode = #tpu.pipeline_mode<synchronous>, transform_indices = @transform_2, window_bounds = array<i64: 12, 128>}, {pipeline_mode = #tpu.pipeline_mode<synchronous>, transform_indices = @transform_3, window_bounds = array<i64: 4, 128>}, {pipeline_mode = #tpu.pipeline_mode<synchronous>, transform_indices = @transform_4, window_bounds = array<i64: 1, 128>}, {pipeline_mode = #tpu.pipeline_mode<synchronous>, transform_indices = @transform_5, window_bounds = array<i64: 128, 128>}, {pipeline_mode = #tpu.pipeline_mode<synchronous>, transform_indices = @transform_6, window_bounds = array<i64: 1, 128>}, {pipeline_mode = #tpu.pipeline_mode<synchronous>, transform_indices = @transform_7, window_bounds = array<i64: 1, 128>}, {pipeline_mode = #tpu.pipeline_mode<synchronous>, transform_indices = @transform_8, window_bounds = array<i64: 1, 1>}, {transform_indices = @transform_9, window_bounds = array<i64: 1, 128>}]} {
    %c0 = arith.constant 0 : index
    %c0_0 = arith.constant 0 : index
    %0 = vector.load %arg1[%c0, %c0_0] : memref<128x12xf32, #tpu.memory_space<vmem>>, vector<128x12xf32>
    %c0_1 = arith.constant 0 : index
    %c0_2 = arith.constant 0 : index
    %1 = vector.load %arg3[%c0_1, %c0_2] : memref<12x128xf32, #tpu.memory_space<vmem>>, vector<12x128xf32>
    %cst = arith.constant dense<0.000000e+00> : vector<128x128xf32>
    %2 = tpu.matmul %0, %1, %cst {dimension_numbers = #tpu.dot_dimension_numbers<[1], [0], [0], [1], [0, 0, 1, 1], [], []>} : vector<128x12xf32>, vector<12x128xf32>, vector<128x128xf32> -> vector<128x128xf32>
    %c0_3 = arith.constant 0 : index
    %c0_4 = arith.constant 0 : index
    %3 = vector.load %arg2[%c0_3, %c0_4] : memref<128x4xf32, #tpu.memory_space<vmem>>, vector<128x4xf32>
    %c0_5 = arith.constant 0 : index
    %c0_6 = arith.constant 0 : index
    %4 = vector.load %arg4[%c0_5, %c0_6] : memref<4x128xf32, #tpu.memory_space<vmem>>, vector<4x128xf32>
    %cst_7 = arith.constant dense<0.000000e+00> : vector<128x128xf32>
    %5 = tpu.matmul %3, %4, %cst_7 {dimension_numbers = #tpu.dot_dimension_numbers<[1], [0], [0], [1], [0, 0, 1, 1], [], []>} : vector<128x4xf32>, vector<4x128xf32>, vector<128x128xf32> -> vector<128x128xf32>
    %6 = arith.addf %2, %5 : vector<128x128xf32>
    %c0_8 = arith.constant 0 : index
    %c0_9 = arith.constant 0 : index
    %7 = vector.load %arg5[%c0_8, %c0_9] : memref<1x128xf32, #tpu.memory_space<vmem>>, vector<1x128xf32>
    %8 = vector.broadcast %7 : vector<1x128xf32> to vector<128x128xf32>
    %9 = arith.addf %6, %8 : vector<128x128xf32>
    %cst_10 = arith.constant 0.000000e+00 : f32
    %10 = vector.broadcast %cst_10 : f32 to vector<128x128xf32>
    %11 = arith.maximumf %9, %10 : vector<128x128xf32>
    %c0_11 = arith.constant 0 : index
    %c0_12 = arith.constant 0 : index
    %12 = vector.load %arg6[%c0_11, %c0_12] : memref<128x128xf32, #tpu.memory_space<vmem>>, vector<128x128xf32>
    %cst_13 = arith.constant dense<0.000000e+00> : vector<128x128xf32>
    %13 = tpu.matmul %11, %12, %cst_13 {dimension_numbers = #tpu.dot_dimension_numbers<[1], [0], [0], [1], [0, 0, 1, 1], [], []>} : vector<128x128xf32>, vector<128x128xf32>, vector<128x128xf32> -> vector<128x128xf32>
    %c0_14 = arith.constant 0 : index
    %c0_15 = arith.constant 0 : index
    %14 = vector.load %arg7[%c0_14, %c0_15] : memref<1x128xf32, #tpu.memory_space<vmem>>, vector<1x128xf32>
    %15 = vector.broadcast %14 : vector<1x128xf32> to vector<128x128xf32>
    %16 = arith.addf %13, %15 : vector<128x128xf32>
    %cst_16 = arith.constant 0.000000e+00 : f32
    %17 = vector.broadcast %cst_16 : f32 to vector<128x128xf32>
    %18 = arith.maximumf %16, %17 : vector<128x128xf32>
    %c0_17 = arith.constant 0 : index
    %c0_18 = arith.constant 0 : index
    %19 = vector.load %arg8[%c0_17, %c0_18] : memref<1x128xf32, #tpu.memory_space<vmem>>, vector<1x128xf32>
    %20 = vector.broadcast %19 : vector<1x128xf32> to vector<128x128xf32>
    %21 = arith.mulf %18, %20 : vector<128x128xf32>
    %cst_19 = arith.constant dense<0.000000e+00> : vector<128xf32>
    %22 = vector.multi_reduction <add>, %21, %cst_19 [1] : vector<128x128xf32> to vector<128xf32>
    %23 = vector.shape_cast %22 : vector<128xf32> to vector<1x128xf32>
    %c0_20 = arith.constant 0 : index
    %c0_21 = arith.constant 0 : index
    %24 = vector.load %arg9[%c0_20, %c0_21] : memref<1x1xf32, #tpu.memory_space<vmem>>, vector<1x1xf32>
    %25 = vector.broadcast %24 : vector<1x1xf32> to vector<1x128xf32>
    %26 = arith.addf %23, %25 : vector<1x128xf32>
    %c0_22 = arith.constant 0 : index
    %c0_23 = arith.constant 0 : index
    %27 = vector.load %arg10[%c0_22, %c0_23] : memref<1x128xf32, #tpu.memory_space<vmem>>, vector<1x128xf32>
    tpu.vector_store %arg10[%c0_22, %c0_23], %26 {strides = array<i32>} : memref<1x128xf32, #tpu.memory_space<vmem>>, vector<1x128xf32>,
    return
  }
  func.func @transform_0(%arg0: i32) -> (i32, i32) {
    %c0_i32 = arith.constant 0 : i32
    %c0_i32_0 = arith.constant 0 : i32
    return %arg0, %c0_i32 : i32, i32
  }
  func.func @transform_1(%arg0: i32) -> (i32, i32) {
    %c0_i32 = arith.constant 0 : i32
    %c0_i32_0 = arith.constant 0 : i32
    return %arg0, %c0_i32 : i32, i32
  }
  func.func @transform_2(%arg0: i32) -> (i32, i32) {
    %c0_i32 = arith.constant 0 : i32
    %c0_i32_0 = arith.constant 0 : i32
    %c0_i32_1 = arith.constant 0 : i32
    return %c0_i32, %c0_i32_0 : i32, i32
  }
  func.func @transform_3(%arg0: i32) -> (i32, i32) {
    %c0_i32 = arith.constant 0 : i32
    %c0_i32_0 = arith.constant 0 : i32
    %c0_i32_1 = arith.constant 0 : i32
    return %c0_i32, %c0_i32_0 : i32, i32
  }
  func.func @transform_4(%arg0: i32) -> (i32, i32) {
    %c0_i32 = arith.constant 0 : i32
    %c0_i32_0 = arith.constant 0 : i32
    %c0_i32_1 = arith.constant 0 : i32
    return %c0_i32, %c0_i32_0 : i32, i32
  }
  func.func @transform_5(%arg0: i32) -> (i32, i32) {
    %c0_i32 = arith.constant 0 : i32
    %c0_i32_0 = arith.constant 0 : i32
    %c0_i32_1 = arith.constant 0 : i32
    return %c0_i32, %c0_i32_0 : i32, i32
  }
  func.func @transform_6(%arg0: i32) -> (i32, i32) {
    %c0_i32 = arith.constant 0 : i32
    %c0_i32_0 = arith.constant 0 : i32
    %c0_i32_1 = arith.constant 0 : i32
    return %c0_i32, %c0_i32_0 : i32, i32
  }
  func.func @transform_7(%arg0: i32) -> (i32, i32) {
    %c0_i32 = arith.constant 0 : i32
    %c0_i32_0 = arith.constant 0 : i32
    %c0_i32_1 = arith.constant 0 : i32
    return %c0_i32, %c0_i32_0 : i32, i32
  }
  func.func @transform_8(%arg0: i32) -> (i32, i32) {
    %c0_i32 = arith.constant 0 : i32
    %c0_i32_0 = arith.constant 0 : i32
    %c0_i32_1 = arith.constant 0 : i32
    return %c0_i32, %c0_i32_0 : i32, i32
  }
  func.func @transform_9(%arg0: i32) -> (i32, i32) {
    %c0_i32 = arith.constant 0 : i32
    %c0_i32_0 = arith.constant 0 : i32
    return %c0_i32, %arg0 : i32, i32
  }
}

</mosaic_0001>

<bundles_post_ra>
// kernel: tpu_custom_call.1
= control target key start
LH: loop header
LB: loop body
LE: loop exit
PB: predicated region body
PF: predicated region fallthrough
CT: control target
= control target key end

     0   :  { %s1045_s0 = inlined_call_operand.vmem [shape: f32[128,12], index: 0, kind: input, shape index: {}]   ;;  %s1046_s1 = inlined_call_operand.vmem [shape: f32[128,4], index: 1, kind: input, shape index: {}]   ;;  %s1047_s2 = inlined_call_operand.vmem [shape: f32[12,128], index: 2, kind: input, shape index: {}]   ;;  %s1048_s3 = inlined_call_operand.vmem [shape: f32[4,128], index: 3, kind: input, shape index: {}]   ;;  %s1049_s4 = inlined_call_operand.vmem [shape: f32[1,128], index: 4, kind: input, shape index: {}]   ;;  %s1050_s5 = inlined_call_operand.vmem [shape: f32[128,128], index: 5, kind: input, shape index: {}]   ;;  %s1051_s6 = inlined_call_operand.vmem [shape: f32[1,128], index: 6, kind: input, shape index: {}]   ;;  %s1052_s7 = inlined_call_operand.vmem [shape: f32[1,128], index: 7, kind: input, shape index: {}]   ;;  %s1053_s8 = inlined_call_operand.<no memory space> [shape: f32[1,1], index: 8, kind: input, shape index: {}]   ;;  %s1054_s9 = inlined_call_operand.hbm [shape: f32[1,128], index: 9, kind: output, shape index: {}]  }
   0x1   :  { %v14_v0 = vstv %s1053_s8 }
   0x2   :  { %15 = vst [vmem:[#allocation2] sm:$0x1] %v14_v0 }
   0x3   :  { %v52_v1 = vld [vmem:[%s1047_s2 + $0x8] sm:$0xf]  ;;  %vm119_vm0 = vcmask 1043456   ;;  %v69_v2 = vld [vmem:[%s1048_s3] sm:$0xf]  ;;  %vm70_vm1 = vcmask 31744  }
   0x4   :  { %v51_v3 = vld [vmem:[%s1047_s2] sm:$0xff]  ;;  %631 = vmatpush.msk.msra.mxu1 %vm119_vm0, %v52_v1  ;;  %614 = vmatpush.msk.msra.mxu0 %vm119_vm0, %v69_v2  ;;  %vm188_vm2 = vcmask 97280  }
   0x5   :  { %v53_v4 = vld [vmem:[%s1046_s1] sm:$0xff] }
   0x6   :  { %v35_v5 = vld [vmem:[%s1045_s0] sm:$0xff]  ;;  %615 = vmatmul.msk.f32.vlgmr.msra.gmra.mxu0 %vm70_vm1, %v53_v4  ;;  %255 = vmatpush.msra.mxu1 %v51_v3 }
   0x7   :  { %632 = vmatmul.msk.f32.vlgmr.msra.gmra.mxu1 %vm188_vm2, %v35_v5 }
   0x8   :  { %16 = vsyncpa [#allocation4], 0  ;;  %v54_v6 = vld [vmem:[%s1046_s1 + $0x8] sm:$0xff]  ;;  %v55_v8 = vld [vmem:[%s1046_s1 + $0x10] sm:$0xff]  ;;  %vm538_vm3 = vcmask 130112   ;;  %vm542_vm4 = vcmask 195712  }
   0x9   :  { %v36_v7 = vld [vmem:[%s1045_s0 + $0x8] sm:$0xff]  ;;  %v37_v9 = vld [vmem:[%s1045_s0 + $0x10] sm:$0xff]  ;;  %v56_v10 = vld [vmem:[%s1046_s1 + $0x18] sm:$0xff]  ;;  %vm546_vm5 = vcmask 261312   ;;  %vm550_vm6 = vcmask 326912   ;;  %vm554_vm7 = vcmask 392512  }
   0xa   :  { %v38_v11 = vld [vmem:[%s1045_s0 + $0x18] sm:$0xff]  ;;  %v57_v12 = vld [vmem:[%s1046_s1 + $0x20] sm:$0xff]  ;;  %v58_v14 = vld [vmem:[%s1046_s1 + $0x28] sm:$0xff]  ;;  %vm558_vm8 = vcmask 458112   ;;  %vm562_vm9 = vcmask 523712   ;;  %vm566_vm10 = vcmask 589312  }
   0xb   :  { %v39_v13 = vld [vmem:[%s1045_s0 + $0x20] sm:$0xff]  ;;  %v40_v15 = vld [vmem:[%s1045_s0 + $0x28] sm:$0xff]  ;;  %v59_v16 = vld [vmem:[%s1046_s1 + $0x30] sm:$0xff]  ;;  %vm570_vm11 = vcmask 654912   ;;  %vm574_vm12 = vcmask 720512   ;;  %vm578_vm13 = vcmask 786112  }
   0xc   :  { %v41_v17 = vld [vmem:[%s1045_s0 + $0x30] sm:$0xff]  ;;  %v60_v18 = vld [vmem:[%s1046_s1 + $0x38] sm:$0xff]  ;;  %v61_v20 = vld [vmem:[%s1046_s1 + $0x40] sm:$0xff]  ;;  %vm582_vm14 = vcmask 851712   ;;  %vm586_vm15 = vcmask 917312   ;;  %vm590_vm0 = vcmask 982912  }
   0xd   :  { %v42_v19 = vld [vmem:[%s1045_s0 + $0x38] sm:$0xff]  ;;  %v43_v21 = vld [vmem:[%s1045_s0 + $0x40] sm:$0xff]  ;;  %v355_v23 = vld [vmem:[%s1050_s5 + $0x70] sm:$0xff]  ;;  %s605_s3 = sshll.u32 %s1054_s9, 4  ;;  %s606_s3 = int_to_ptr.hbm [resolvable:$true] %s605_s3 }
   0xe   :  { %616 = vmatmul.msk.f32.gmra.mxu0 %vm70_vm1, %v54_v6  ;;  %v356_v22 = vld [vmem:[%s1050_s5 + $0x78] sm:$0xff]  ;;  %v62_v24 = vld [vmem:[%s1046_s1 + $0x48] sm:$0xff]  ;;  %v353_v27 = vld [vmem:[%s1050_s5 + $0x60] sm:$0xff] }
   0xf   :  { %633 = vmatmul.msk.f32.gmra.mxu1 %vm188_vm2, %v36_v7  ;;  %361 = vmatpush.msra.mxu2 %v356_v22  ;;  %v44_v25 = vld [vmem:[%s1045_s0 + $0x48] sm:$0xff]  ;;  %v352_v28 = vld [vmem:[%s1050_s5 + $0x58] sm:$0xff]  ;;  %v63_v29 = vld [vmem:[%s1046_s1 + $0x50] sm:$0xff] }
  0x10   :  { %648 = vmatpush.msra.mxu3 %v356_v22  ;;  %v354_v26 = vld [vmem:[%s1050_s5 + $0x68] sm:$0xff]  ;;  %v351_v30 = vld [vmem:[%s1050_s5 + $0x50] sm:$0xff]  ;;  %v349_v33 = vld [vmem:[%s1050_s5 + $0x40] sm:$0xff] }
  0x11   :  { %362 = vmatpush.msra.mxu2 %v355_v23  ;;  %v45_v31 = vld [vmem:[%s1045_s0 + $0x50] sm:$0xff]  ;;  %v350_v32 = vld [vmem:[%s1050_s5 + $0x48] sm:$0xff]  ;;  %v348_v34 = vld [vmem:[%s1050_s5 + $0x38] sm:$0xff] }
  0x12   :  { %649 = vmatpush.msra.mxu3 %v355_v23  ;;  %v64_v35 = vld [vmem:[%s1046_s1 + $0x58] sm:$0xff]  ;;  %v347_v36 = vld [vmem:[%s1050_s5 + $0x30] sm:$0xff]  ;;  %v346_v38 = vld [vmem:[%s1050_s5 + $0x28] sm:$0xff] }
  0x13   :  { %363 = vmatpush.msra.mxu2 %v354_v26  ;;  %v46_v37 = vld [vmem:[%s1045_s0 + $0x58] sm:$0xff]  ;;  %v345_v39 = vld [vmem:[%s1050_s5 + $0x20] sm:$0xff]  ;;  %v343_v43 = vld [vmem:[%s1050_s5 + $0x10] sm:$0xff] }
  0x14   :  { %650 = vmatpush.msra.mxu3 %v354_v26  ;;  %v65_v40 = vld [vmem:[%s1046_s1 + $0x60] sm:$0xff]  ;;  %v344_v41 = vld [vmem:[%s1050_s5 + $0x18] sm:$0xff]  ;;  %v342_v44 = vld [vmem:[%s1050_s5 + $0x8] sm:$0xff] }
  0x15   :  { %364 = vmatpush.msra.mxu2 %v353_v27  ;;  %v47_v42 = vld [vmem:[%s1045_s0 + $0x60] sm:$0xff]  ;;  %v66_v46 = vld [vmem:[%s1046_s1 + $0x68] sm:$0xff]  ;;  %v67_v48 = vld [vmem:[%s1046_s1 + $0x70] sm:$0xff] }
  0x16   :  { %617 = vmatmul.msk.f32.gmra.mxu0 %vm70_vm1, %v55_v8  ;;  %651 = vmatpush.msra.mxu3 %v353_v27  ;;  %v341_v45 = vld [vmem:[%s1050_s5] sm:$0xff]  ;;  %v48_v47 = vld [vmem:[%s1045_s0 + $0x68] sm:$0xff]  ;;  %v49_v49 = vld [vmem:[%s1045_s0 + $0x70] sm:$0xff] }
  0x17   :  { %634 = vmatmul.msk.f32.gmra.mxu1 %vm188_vm2, %v37_v9  ;;  %365 = vmatpush.msra.mxu2 %v352_v28  ;;  %v68_v50 = vld [vmem:[%s1046_s1 + $0x78] sm:$0xff]  ;;  %v939_v53 = vld [vmem:[%s1049_s4] ss:$0 sm:$0xff] }
  0x18   :  { %652 = vmatpush.msra.mxu3 %v352_v28  ;;  %v50_v51 = vld [vmem:[%s1045_s0 + $0x78] sm:$0xff] }
  0x19   :  { %366 = vmatpush.msra.mxu2 %v351_v30 }
  0x1a   :  { %653 = vmatpush.msra.mxu3 %v351_v30 }
  0x1b   :  { %367 = vmatpush.msra.mxu2 %v350_v32 }
  0x1c   :  { %654 = vmatpush.msra.mxu3 %v350_v32  ;;  %v494_v32 = vld [vmem:[#allocation2] sm:$0x1] }
  0x1d   :  { %368 = vmatpush.msra.mxu2 %v349_v33 }
  0x1e   :  { %618 = vmatmul.msk.f32.gmra.mxu0 %vm70_vm1, %v56_v10  ;;  %655 = vmatpush.msra.mxu3 %v349_v33  ;;  %v696_v33 = vmov 0  }
  0x1f   :  { %635 = vmatmul.msk.f32.gmra.mxu1 %vm188_vm2, %v38_v11  ;;  %369 = vmatpush.msra.mxu2 %v348_v34 }
  0x20   :  { %656 = vmatpush.msra.mxu3 %v348_v34  ;;  %666 = vset.pattern.permute.xlu0 %v696_v33 }
  0x21   :  { %370 = vmatpush.msra.mxu2 %v347_v36  ;;  %497 = vperm.xlu0 %666, %v494_v32  }
  0x22   :  { %657 = vmatpush.msra.mxu3 %v347_v36 }
  0x23   :  { %371 = vmatpush.msra.mxu2 %v346_v38 }
  0x24   :  { %658 = vmatpush.msra.mxu3 %v346_v38 }
  0x25   :  { %372 = vmatpush.msra.mxu2 %v345_v39 }
  0x26   :  { %619 = vmatmul.msk.f32.gmra.mxu0 %vm70_vm1, %v57_v12  ;;  %659 = vmatpush.msra.mxu3 %v345_v39 }
  0x27   :  { %636 = vmatmul.msk.f32.gmra.mxu1 %vm188_vm2, %v39_v13  ;;  %373 = vmatpush.msra.mxu2 %v344_v41 }
  0x28   :  { %660 = vmatpush.msra.mxu3 %v344_v41 }
  0x29   :  { %374 = vmatpush.msra.mxu2 %v343_v43 }
  0x2a   :  { %661 = vmatpush.msra.mxu3 %v343_v43 }
  0x2b   :  { %375 = vmatpush.msra.mxu2 %v342_v44 }
  0x2c   :  { %662 = vmatpush.msra.mxu3 %v342_v44 }
  0x2d   :  { %376 = vmatpush.msra.mxu2 %v341_v45 }
  0x2e   :  { %620 = vmatmul.msk.f32.gmra.mxu0 %vm70_vm1, %v58_v14  ;;  %663 = vmatpush.msra.mxu3 %v341_v45 }
  0x2f   :  { %637 = vmatmul.msk.f32.gmra.mxu1 %vm188_vm2, %v40_v15 }
  0x36   :  { %621 = vmatmul.msk.f32.gmra.mxu0 %vm70_vm1, %v59_v16 }
  0x37   :  { %638 = vmatmul.msk.f32.gmra.mxu1 %vm188_vm2, %v41_v17 }
  0x3e   :  { %622 = vmatmul.msk.f32.gmra.mxu0 %vm70_vm1, %v60_v18 }
  0x3f   :  { %639 = vmatmul.msk.f32.gmra.mxu1 %vm188_vm2, %v42_v19 }
  0x46   :  { %623 = vmatmul.msk.f32.gmra.mxu0 %vm70_vm1, %v61_v20 }
  0x47   :  { %640 = vmatmul.msk.f32.gmra.mxu1 %vm188_vm2, %v43_v21 }
  0x4e   :  { %624 = vmatmul.msk.f32.gmra.mxu0 %vm70_vm1, %v62_v24 }
  0x4f   :  { %641 = vmatmul.msk.f32.gmra.mxu1 %vm188_vm2, %v44_v25 }
  0x56   :  { %625 = vmatmul.msk.f32.gmra.mxu0 %vm70_vm1, %v63_v29 }
  0x57   :  { %642 = vmatmul.msk.f32.gmra.mxu1 %vm188_vm2, %v45_v31 }
  0x5e   :  { %626 = vmatmul.msk.f32.gmra.mxu0 %vm70_vm1, %v64_v35 }
  0x5f   :  { %643 = vmatmul.msk.f32.gmra.mxu1 %vm188_vm2, %v46_v37 }
  0x66   :  { %627 = vmatmul.msk.f32.gmra.mxu0 %vm70_vm1, %v65_v40 }
  0x67   :  { %644 = vmatmul.msk.f32.gmra.mxu1 %vm188_vm2, %v47_v42 }
  0x6e   :  { %628 = vmatmul.msk.f32.gmra.mxu0 %vm70_vm1, %v66_v46 }
  0x6f   :  { %645 = vmatmul.msk.f32.gmra.mxu1 %vm188_vm2, %v48_v47 }
  0x76   :  { %629 = vmatmul.msk.f32.gmra.mxu0 %vm70_vm1, %v67_v48 }
  0x77   :  { %646 = vmatmul.msk.f32.gmra.mxu1 %vm188_vm2, %v49_v49 }
  0x7e   :  { %630 = vmatmul.msk.f32.gmra.mxu0 %vm70_vm1, %v68_v50  ;;  %vm594_vm1 = vcmask 1048512  }
  0x7f   :  { %647 = vmatmul.msk.f32.gmra.mxu1 %vm188_vm2, %v50_v51 }
  0x83   :  { %v140_v52 = vpop.f32.mrf.mxu0 }
  0x84   :  { %v257_v54 = vpop.f32.mrf.mxu1 }
  0x85   :  { %v258_v55 = vadd.f32 %v257_v54, %v140_v52 }
  0x87   :  { %v309_v56 = vadd.f32 %v939_v53, %v258_v55 }
  0x89   :  { %v325_v57 = vmax.f32 %v309_v56, 0.0 }
  0x8b   :  { %v143_v58 = vpop.f32.mrf.mxu0  ;;  %377 = vmatmul.f32.vlgmr.msra.gmra.mxu2 %v325_v57 }
  0x8c   :  { %v260_v59 = vpop.f32.mrf.mxu1 }
  0x8d   :  { %v261_v60 = vadd.f32 %v260_v59, %v143_v58 }
  0x8f   :  { %v310_v61 = vadd.f32 %v939_v53, %v261_v60 }
  0x91   :  { %v326_v62 = vmax.f32 %v310_v61, 0.0 }
  0x93   :  { %v146_v63 = vpop.f32.mrf.mxu0  ;;  %380 = vmatmul.f32.gmra.mxu2 %v326_v62 }
  0x94   :  { %v263_v0 = vpop.f32.mrf.mxu1 }
  0x95   :  { %v264_v1 = vadd.f32 %v263_v0, %v146_v63 }
  0x97   :  { %v311_v2 = vadd.f32 %v939_v53, %v264_v1 }
  0x99   :  { %v327_v3 = vmax.f32 %v311_v2, 0.0 }
  0x9b   :  { %v149_v4 = vpop.f32.mrf.mxu0  ;;  %383 = vmatmul.f32.gmra.mxu2 %v327_v3 }
  0x9c   :  { %v266_v5 = vpop.f32.mrf.mxu1 }
  0x9d   :  { %v267_v6 = vadd.f32 %v266_v5, %v149_v4 }
  0x9f   :  { %v312_v7 = vadd.f32 %v939_v53, %v267_v6 }
  0xa1   :  { %v328_v8 = vmax.f32 %v312_v7, 0.0 }
  0xa3   :  { %v152_v9 = vpop.f32.mrf.mxu0  ;;  %386 = vmatmul.f32.gmra.mxu2 %v328_v8  ;;  %v960_v8 = vld [vmem:[%s1051_s6] ss:$0 sm:$0xff]  ;;  %s697_s6 = smov [#allocation3]  }
  0xa4   :  { %v269_v10 = vpop.f32.mrf.mxu1 }
  0xa5   :  { %v270_v11 = vadd.f32 %v269_v10, %v152_v9 }
  0xa7   :  { %v313_v12 = vadd.f32 %v939_v53, %v270_v11  ;;  %v966_v11 = vld [vmem:[%s1052_s7] ss:$0 sm:$0xff]  ;;  %s603_s7 = sshll.u32 %s697_s6, 4  ;;  %s604_s7 = int_to_ptr.vmem [resolvable:$true] %s603_s7 }
  0xa9   :  { %v329_v13 = vmax.f32 %v313_v12, 0.0 }
  0xab   :  { %v155_v14 = vpop.f32.mrf.mxu0  ;;  %389 = vmatmul.f32.gmra.mxu2 %v329_v13 }
  0xac   :  { %v272_v15 = vpop.f32.mrf.mxu1 }
  0xad   :  { %v273_v16 = vadd.f32 %v272_v15, %v155_v14 }
  0xaf   :  { %v314_v17 = vadd.f32 %v939_v53, %v273_v16 }
  0xb1   :  { %v330_v18 = vmax.f32 %v314_v17, 0.0 }
  0xb3   :  { %v158_v19 = vpop.f32.mrf.mxu0  ;;  %392 = vmatmul.f32.gmra.mxu2 %v330_v18 }
  0xb4   :  { %v275_v20 = vpop.f32.mrf.mxu1 }
  0xb5   :  { %v276_v21 = vadd.f32 %v275_v20, %v158_v19 }
  0xb7   :  { %v315_v22 = vadd.f32 %v939_v53, %v276_v21 }
  0xb9   :  { %v331_v23 = vmax.f32 %v315_v22, 0.0 }
  0xbb   :  { %v161_v24 = vpop.f32.mrf.mxu0  ;;  %395 = vmatmul.f32.gmra.mxu2 %v331_v23 }
  0xbc   :  { %v278_v25 = vpop.f32.mrf.mxu1 }
  0xbd   :  { %v279_v26 = vadd.f32 %v278_v25, %v161_v24 }
  0xbf   :  { %v316_v27 = vadd.f32 %v939_v53, %v279_v26 }
  0xc1   :  { %v332_v28 = vmax.f32 %v316_v27, 0.0 }
  0xc3   :  { %v164_v29 = vpop.f32.mrf.mxu0  ;;  %398 = vmatmul.f32.gmra.mxu2 %v332_v28 }
  0xc4   :  { %v281_v30 = vpop.f32.mrf.mxu1 }
  0xc5   :  { %v282_v31 = vadd.f32 %v281_v30, %v164_v29 }
  0xc7   :  { %v317_v34 = vadd.f32 %v939_v53, %v282_v31 }
  0xc9   :  { %v333_v35 = vmax.f32 %v317_v34, 0.0 }
  0xcb   :  { %v167_v36 = vpop.f32.mrf.mxu0  ;;  %401 = vmatmul.f32.gmra.mxu2 %v333_v35 }
  0xcc   :  { %v284_v37 = vpop.f32.mrf.mxu1 }
  0xcd   :  { %v285_v38 = vadd.f32 %v284_v37, %v167_v36 }
  0xcf   :  { %v318_v39 = vadd.f32 %v939_v53, %v285_v38 }
  0xd1   :  { %v334_v40 = vmax.f32 %v318_v39, 0.0 }
  0xd3   :  { %v170_v41 = vpop.f32.mrf.mxu0  ;;  %404 = vmatmul.f32.gmra.mxu2 %v334_v40 }
  0xd4   :  { %v287_v42 = vpop.f32.mrf.mxu1 }
  0xd5   :  { %v288_v43 = vadd.f32 %v287_v42, %v170_v41 }
  0xd7   :  { %v319_v44 = vadd.f32 %v939_v53, %v288_v43 }
  0xd9   :  { %v335_v45 = vmax.f32 %v319_v44, 0.0 }
  0xdb   :  { %v173_v46 = vpop.f32.mrf.mxu0  ;;  %407 = vmatmul.f32.gmra.mxu2 %v335_v45 }
  0xdc   :  { %v290_v47 = vpop.f32.mrf.mxu1 }
  0xdd   :  { %v291_v48 = vadd.f32 %v290_v47, %v173_v46 }
  0xdf   :  { %v320_v49 = vadd.f32 %v939_v53, %v291_v48 }
  0xe1   :  { %v336_v50 = vmax.f32 %v320_v49, 0.0 }
  0xe3   :  { %v176_v51 = vpop.f32.mrf.mxu0  ;;  %410 = vmatmul.f32.vlgmr.msra.gmra.mxu3 %v336_v50 }
  0xe4   :  { %v293_v52 = vpop.f32.mrf.mxu1 }
  0xe5   :  { %v294_v54 = vadd.f32 %v293_v52, %v176_v51 }
  0xe7   :  { %v321_v55 = vadd.f32 %v939_v53, %v294_v54 }
  0xe9   :  { %v337_v56 = vmax.f32 %v321_v55, 0.0 }
  0xeb   :  { %v179_v57 = vpop.f32.mrf.mxu0  ;;  %413 = vmatmul.f32.gmra.mxu3 %v337_v56 }
  0xec   :  { %v296_v58 = vpop.f32.mrf.mxu1 }
  0xed   :  { %v297_v59 = vadd.f32 %v296_v58, %v179_v57 }
  0xef   :  { %v322_v60 = vadd.f32 %v939_v53, %v297_v59 }
  0xf1   :  { %v338_v61 = vmax.f32 %v322_v60, 0.0 }
  0xf3   :  { %v182_v62 = vpop.f32.mrf.mxu0  ;;  %416 = vmatmul.f32.gmra.mxu3 %v338_v61 }
  0xf4   :  { %v299_v63 = vpop.f32.mrf.mxu1 }
  0xf5   :  { %v300_v0 = vadd.f32 %v299_v63, %v182_v62 }
  0xf7   :  { %v323_v1 = vadd.f32 %v939_v53, %v300_v0 }
  0xf9   :  { %v339_v2 = vmax.f32 %v323_v1, 0.0 }
  0xfb   :  { %v185_v3 = vpop.f32.mrf.mxu0  ;;  %419 = vmatmul.f32.gmra.mxu3 %v339_v2 }
  0xfc   :  { %v302_v4 = vpop.f32.mrf.mxu1 }
  0xfd   :  { %v303_v5 = vadd.f32 %v302_v4, %v185_v3 }
  0xff   :  { %v324_v6 = vadd.f32 %v939_v53, %v303_v5 }
 0x101   :  { %v340_v7 = vmax.f32 %v324_v6, 0.0 }
 0x103   :  { %422 = vmatmul.f32.gmra.mxu3 %v340_v7 }
 0x10e   :  { %v378_v9 = vpop.f32.mrf.mxu2 }
 0x10f   :  { %v379_v10 = vadd.f32 %v960_v8, %v378_v9 }
 0x111   :  { %v426_v12 = vmax.f32 %v379_v10, 0.0 }
 0x113   :  { %v446_v13 = vmul.f32 %v966_v11, %v426_v12 }
 0x115   :  { %462 = vadd.xlane.f32.xlu0 %v446_v13 }
 0x116   :  { %v381_v53 = vpop.f32.mrf.mxu2 }
 0x117   :  { %v382_v14 = vadd.f32 %v960_v8, %v381_v53 }
 0x119   :  { %v427_v15 = vmax.f32 %v382_v14, 0.0 }
 0x11b   :  { %v447_v16 = vmul.f32 %v966_v11, %v427_v15 }
 0x11d   :  { %464 = vadd.xlane.f32.xlu1 %v447_v16 }
 0x11e   :  { %v384_v17 = vpop.f32.mrf.mxu2 }
 0x11f   :  { %v385_v18 = vadd.f32 %v960_v8, %v384_v17 }
 0x121   :  { %v428_v19 = vmax.f32 %v385_v18, 0.0  ;;  %v498_v18 = vpop.permute.xlu0 %497 }
 0x123   :  { %v448_v20 = vmul.f32 %v966_v11, %v428_v19 }
 0x125   :  { %466 = vadd.xlane.f32.xlu1 %v448_v20  ;;  %v533_v20 = vlaneseq }
 0x126   :  { %v387_v21 = vpop.f32.mrf.mxu2 }
 0x127   :  { %v388_v22 = vadd.f32 %v960_v8, %v387_v21 }
 0x129   :  { %v429_v23 = vmax.f32 %v388_v22, 0.0 }
 0x12b   :  { %v449_v24 = vmul.f32 %v966_v11, %v429_v23  ;;  %v999_v23 = vperm.slane %v498_v18, 0 }
 0x12d   :  { %468 = vadd.xlane.f32.xlu2 %v449_v24  ;;  %v1001_v24 = vand.u32 127, %v533_v20 }
 0x12e   :  { %v390_v25 = vpop.f32.mrf.mxu2 }
 0x12f   :  { %v391_v26 = vadd.f32 %v960_v8, %v390_v25  ;;  %v592_v18 = vadd.s32 4294967176, %v1001_v24 }
 0x131   :  { %v430_v27 = vmax.f32 %v391_v26, 0.0 }
 0x133   :  { %v450_v28 = vmul.f32 %v966_v11, %v430_v27  ;;  %v540_v27 = vadd.s32 4294967280, %v1001_v24 }
 0x135   :  { %470 = vadd.xlane.f32.xlu2 %v450_v28 }
 0x136   :  { %v393_v29 = vpop.f32.mrf.mxu2 }
 0x137   :  { %v394_v30 = vadd.f32 %v960_v8, %v393_v29  ;;  %v544_v29 = vadd.s32 4294967272, %v1001_v24 }
 0x139   :  { %v431_v31 = vmax.f32 %v394_v30, 0.0 }
 0x13b   :  { %v451_v32 = vmul.f32 %v966_v11, %v431_v31 }
 0x13d   :  { %472 = vadd.xlane.f32.xlu1 %v451_v32 }
 0x13e   :  { %v396_v33 = vpop.f32.mrf.mxu2 }
 0x13f   :  { %v397_v34 = vadd.f32 %v960_v8, %v396_v33  ;;  %v548_v33 = vadd.s32 4294967264, %v1001_v24 }
 0x141   :  { %v432_v35 = vmax.f32 %v397_v34, 0.0 }
 0x143   :  { %v452_v36 = vmul.f32 %v966_v11, %v432_v35 }
 0x145   :  { %474 = vadd.xlane.f32.xlu2 %v452_v36 }
 0x146   :  { %v399_v37 = vpop.f32.mrf.mxu2 }
 0x147   :  { %v400_v38 = vadd.f32 %v960_v8, %v399_v37 }
 0x149   :  { %v433_v39 = vmax.f32 %v400_v38, 0.0 }
 0x14b   :  { %v453_v40 = vmul.f32 %v966_v11, %v433_v39  ;;  %v552_v39 = vadd.s32 4294967256, %v1001_v24 }
 0x14d   :  { %476 = vadd.xlane.f32.xlu1 %v453_v40 }
 0x14e   :  { %v402_v41 = vpop.f32.mrf.mxu2 }
 0x14f   :  { %v403_v42 = vadd.f32 %v960_v8, %v402_v41 }
 0x151   :  { %v434_v43 = vmax.f32 %v403_v42, 0.0  ;;  %v556_v42 = vadd.s32 4294967248, %v1001_v24 }
 0x153   :  { %v454_v44 = vmul.f32 %v966_v11, %v434_v43 }
 0x155   :  { %478 = vadd.xlane.f32.xlu2 %v454_v44 }
 0x156   :  { %v405_v45 = vpop.f32.mrf.mxu2 }
 0x157   :  { %v406_v46 = vadd.f32 %v960_v8, %v405_v45  ;;  %v560_v45 = vadd.s32 4294967240, %v1001_v24 }
 0x159   :  { %v435_v47 = vmax.f32 %v406_v46, 0.0 }
 0x15b   :  { %v455_v48 = vmul.f32 %v966_v11, %v435_v47 }
 0x15d   :  { %480 = vadd.xlane.f32.xlu1 %v455_v48  ;;  %v564_v48 = vadd.s32 4294967232, %v1001_v24 }
 0x15e   :  { %v408_v49 = vpop.f32.mrf.mxu2 }
 0x15f   :  { %v409_v50 = vadd.f32 %v960_v8, %v408_v49 }
 0x161   :  { %v436_v51 = vmax.f32 %v409_v50, 0.0 }
 0x163   :  { %v456_v52 = vmul.f32 %v966_v11, %v436_v51 }
 0x165   :  { %482 = vadd.xlane.f32.xlu2 %v456_v52  ;;  %v568_v52 = vadd.s32 4294967224, %v1001_v24 }
 0x166   :  { %v411_v54 = vpop.f32.mrf.mxu3 }
 0x167   :  { %v412_v55 = vadd.f32 %v960_v8, %v411_v54 }
 0x169   :  { %v437_v56 = vmax.f32 %v412_v55, 0.0 }
 0x16b   :  { %v457_v57 = vmul.f32 %v966_v11, %v437_v56  ;;  %v572_v56 = vadd.s32 4294967216, %v1001_v24 }
 0x16d   :  { %484 = vadd.xlane.f32.xlu1 %v457_v57 }
 0x16e   :  { %v414_v58 = vpop.f32.mrf.mxu3 }
 0x16f   :  { %v415_v59 = vadd.f32 %v960_v8, %v414_v58 }
 0x171   :  { %v438_v60 = vmax.f32 %v415_v59, 0.0 }
 0x173   :  { %v458_v61 = vmul.f32 %v966_v11, %v438_v60 }
 0x175   :  { %486 = vadd.xlane.f32.xlu2 %v458_v61  ;;  %v576_v61 = vadd.s32 4294967208, %v1001_v24 }
 0x176   :  { %v417_v62 = vpop.f32.mrf.mxu3 }
 0x177   :  { %v418_v63 = vadd.f32 %v960_v8, %v417_v62 }
 0x179   :  { %v439_v0 = vmax.f32 %v418_v63, 0.0 }
 0x17b   :  { %v459_v1 = vmul.f32 %v966_v11, %v439_v0 }
 0x17d   :  { %488 = vadd.xlane.f32.xlu1 %v459_v1  ;;  %v580_v1 = vadd.s32 4294967200, %v1001_v24 }
 0x17e   :  { %v420_v2 = vpop.f32.mrf.mxu3 }
 0x17f   :  { %v421_v3 = vadd.f32 %v960_v8, %v420_v2 }
 0x181   :  { %v440_v4 = vmax.f32 %v421_v3, 0.0 }
 0x183   :  { %v460_v5 = vmul.f32 %v966_v11, %v440_v4 }
 0x185   :  { %490 = vadd.xlane.f32.xlu2 %v460_v5  ;;  %v584_v5 = vadd.s32 4294967192, %v1001_v24 }
 0x186   :  { %v423_v6 = vpop.f32.mrf.mxu3 }
 0x187   :  { %v424_v7 = vadd.f32 %v960_v8, %v423_v6 }
 0x188   :  { %v463_v8 = vpop.xlane.xlu0 %462 }
 0x189   :  { %v441_v9 = vmax.f32 %v424_v7, 0.0  ;;  %v501_v26 = vadd.f32 %v999_v23, %v463_v8 }
 0x18b   :  { %v461_v10 = vmul.f32 %v966_v11, %v441_v9  ;;  %v536_v11 = vadd.s32 4294967288, %v1001_v24  ;;  %v535_v36 = vperm.slane %v501_v26, %v1001_v24 }
 0x18d   :  { %492 = vadd.xlane.f32.xlu0 %v461_v10  ;;  %v588_v10 = vadd.s32 4294967184, %v1001_v24 }
 0x190   :  { %v465_v12 = vpop.xlane.xlu1 %464 }
 0x191   :  { %v502_v25 = vadd.f32 %v999_v23, %v465_v12 }
 0x193   :  { %v537_v31 = vperm.slane %v502_v25, %v536_v11 }
 0x195   :  { %v539_v41 = vsel %vm538_vm3, %v537_v31, %v535_v36 }
 0x198   :  { %v467_v53 = vpop.xlane.xlu1 %466 }
 0x199   :  { %v503_v28 = vadd.f32 %v999_v23, %v467_v53 }
 0x19b   :  { %v541_v37 = vperm.slane %v503_v28, %v540_v27 }
 0x19d   :  { %v543_v47 = vsel %vm542_vm4, %v541_v37, %v539_v41 }
 0x1a0   :  { %v469_v13 = vpop.xlane.xlu2 %468 }
 0x1a1   :  { %v504_v30 = vadd.f32 %v999_v23, %v469_v13 }
 0x1a3   :  { %v545_v38 = vperm.slane %v504_v30, %v544_v29 }
 0x1a5   :  { %v547_v50 = vsel %vm546_vm5, %v545_v38, %v543_v47 }
 0x1a8   :  { %v471_v14 = vpop.xlane.xlu2 %470 }
 0x1a9   :  { %v505_v34 = vadd.f32 %v999_v23, %v471_v14 }
 0x1ab   :  { %v549_v44 = vperm.slane %v505_v34, %v548_v33 }
 0x1ad   :  { %v551_v59 = vsel %vm550_vm6, %v549_v44, %v547_v50 }
 0x1b0   :  { %v473_v15 = vpop.xlane.xlu1 %472 }
 0x1b1   :  { %v506_v40 = vadd.f32 %v999_v23, %v473_v15 }
 0x1b3   :  { %v553_v51 = vperm.slane %v506_v40, %v552_v39 }
 0x1b5   :  { %v555_v3 = vsel %vm554_vm7, %v553_v51, %v551_v59 }
 0x1b8   :  { %v475_v16 = vpop.xlane.xlu2 %474 }
 0x1b9   :  { %v507_v43 = vadd.f32 %v999_v23, %v475_v16 }
 0x1bb   :  { %v557_v55 = vperm.slane %v507_v43, %v556_v42 }
 0x1bd   :  { %v559_v7 = vsel %vm558_vm8, %v557_v55, %v555_v3 }
 0x1c0   :  { %v477_v17 = vpop.xlane.xlu1 %476 }
 0x1c1   :  { %v508_v46 = vadd.f32 %v999_v23, %v477_v17 }
 0x1c3   :  { %v561_v60 = vperm.slane %v508_v46, %v560_v45 }
 0x1c5   :  { %v563_v13 = vsel %vm562_vm9, %v561_v60, %v559_v7 }
 0x1c8   :  { %v479_v19 = vpop.xlane.xlu2 %478 }
 0x1c9   :  { %v509_v49 = vadd.f32 %v999_v23, %v479_v19 }
 0x1cb   :  { %v565_v0 = vperm.slane %v509_v49, %v564_v48 }
 0x1cd   :  { %v567_v14 = vsel %vm566_vm10, %v565_v0, %v563_v13 }
 0x1d0   :  { %v481_v21 = vpop.xlane.xlu1 %480 }
 0x1d1   :  { %v510_v54 = vadd.f32 %v999_v23, %v481_v21 }
 0x1d3   :  { %v569_v4 = vperm.slane %v510_v54, %v568_v52 }
 0x1d5   :  { %v571_v16 = vsel %vm570_vm11, %v569_v4, %v567_v14 }
 0x1d8   :  { %v483_v22 = vpop.xlane.xlu2 %482 }
 0x1d9   :  { %v511_v57 = vadd.f32 %v999_v23, %v483_v22 }
 0x1db   :  { %v573_v9 = vperm.slane %v511_v57, %v572_v56 }
 0x1dd   :  { %v575_v19 = vsel %vm574_vm12, %v573_v9, %v571_v16 }
 0x1e0   :  { %v485_v32 = vpop.xlane.xlu1 %484 }
 0x1e1   :  { %v512_v62 = vadd.f32 %v999_v23, %v485_v32 }
 0x1e3   :  { %v577_v53 = vperm.slane %v512_v62, %v576_v61 }
 0x1e5   :  { %v579_v22 = vsel %vm578_vm13, %v577_v53, %v575_v19 }
 0x1e8   :  { %v487_v35 = vpop.xlane.xlu2 %486 }
 0x1e9   :  { %v513_v2 = vadd.f32 %v999_v23, %v487_v35 }
 0x1eb   :  { %v581_v15 = vperm.slane %v513_v2, %v580_v1 }
 0x1ed   :  { %v583_v11 = vsel %vm582_vm14, %v581_v15, %v579_v22 }
 0x1f0   :  { %v489_v58 = vpop.xlane.xlu1 %488 }
 0x1f1   :  { %v514_v6 = vadd.f32 %v999_v23, %v489_v58 }
 0x1f3   :  { %v585_v17 = vperm.slane %v514_v6, %v584_v5 }
 0x1f5   :  { %v587_v25 = vsel %vm586_vm15, %v585_v17, %v583_v11 }
 0x1f8   :  { %v491_v63 = vpop.xlane.xlu2 %490 }
 0x1f9   :  { %v515_v12 = vadd.f32 %v999_v23, %v491_v63 }
 0x1fb   :  { %v589_v20 = vperm.slane %v515_v12, %v588_v10 }
 0x1fd   :  { %v591_v27 = vsel %vm590_vm0, %v589_v20, %v587_v25 }
 0x200   :  { %v493_v21 = vpop.xlane.xlu0 %492 }
 0x201   :  { %v516_v8 = vadd.f32 %v999_v23, %v493_v21 }
 0x203   :  { %v593_v26 = vperm.slane %v516_v8, %v592_v18 }
 0x205   :  { %v595_v24 = vsel %vm594_vm1, %v593_v26, %v591_v27 }
 0x206   :  { %597 = vst [vmem:[#allocation3] sm:$0x1] %v595_v24 }
 0x207   :  { %608 = dma.vmem_to_hbm [thread:$0]  %s604_s7, 16, %s606_s3, [#allocation4]  }
 0x208   :  { %694 = dma.done.wait [#allocation4], 16  }
 0x209   :  { %695 = vsyncadd [#allocation4], 4294967280 }
 0x20a   :  { %613 = vsyncpa [#allocation4], 1 }

</bundles_post_ra>
